<compile_context>
chip_gen: v5e
topology: v5e:2x2
jax: 0.10.0
libtpu: 0.0.40
codegen_flags: <defaults>
</compile_context>

<pallas_src>
import jax
import jax.numpy as jnp
from jax.experimental import pallas as pl
from jax.experimental.pallas import tpu as pltpu


def _relu_kernel(x_ref, o_ref):
    # Elementwise ReLU on the whole VMEM tile (single VPU op, no zeros temp).
    o_ref[...] = jnp.maximum(x_ref[...], 0)


def _pick_lane_width(n: int):
    """Widest lane-dense width (multiple of 128) that divides n, else None."""
    for cand in (4096, 2048, 1024, 512, 256, 128):
        if n % cand == 0:
            return cand
    return None


# ~2 MiB per block: >85% of HBM roofline regime; with double-buffered input
# and output (2 bufs each) the pipelined footprint is ~8 MiB, which fits the
# scoped-VMEM defaults on v5e (16 MiB) as well as v6e / v7x.
_TARGET_BLOCK_BYTES = 2 * 1024 * 1024


def relu_pallas(x: jax.Array, *, min_pallas_elems: int = 65536) -> jax.Array:
    """Elementwise ReLU. Accepts any shape / dtype, returns same shape & dtype."""
    n = x.size
    if n == 0 or n < min_pallas_elems:
        # A pallas_call plus the reshape plumbing costs several microseconds
        # of fixed overhead; for tiny inputs plain XLA maximum fuses for free.
        return jnp.maximum(x, 0)

    orig_shape = x.shape
    flat = x.reshape(-1)

    lane_w = _pick_lane_width(n)
    pad = 0
    if lane_w is None:
        # Rare path (n not a multiple of 128): pay one minimal pad + tail
        # slice.  The common case above goes through with zero extra HBM passes.
        lane_w = 1024
        pad = (-n) % lane_w
        flat = jnp.pad(flat, (0, pad))

    rows = (n + pad) // lane_w
    x2d = flat.reshape(rows, lane_w)

    itemsize = jnp.dtype(x.dtype).itemsize
    # Native packed sublane granularity: 8 rows for 32-bit, 16 for 16-bit,
    # 32 for 8-bit dtypes (keeps blocks aligned to full packed vregs).
    gran = max(8, 32 // max(itemsize, 1))

    if rows <= gran:
        block_rows = rows  # block == full dim -> always a legal block shape
    else:
        block_rows = max(
            gran, (_TARGET_BLOCK_BYTES // (lane_w * itemsize)) // gran * gran
        )
        block_rows = min(block_rows, rows)  # if larger, becomes full dim

    # cdiv grid: Pallas masks the partial last block, so no divisor fallback
    # (and no degenerate tiny tiles) is ever needed.
    grid = (pl.cdiv(rows, block_rows),)

    out2d = pl.pallas_call(
        _relu_kernel,
        out_shape=jax.ShapeDtypeStruct((rows, lane_w), x.dtype),
        grid_spec=pltpu.PrefetchScalarGridSpec(
            num_scalar_prefetch=0,
            grid=grid,
            in_specs=[pl.BlockSpec((block_rows, lane_w), lambda i: (i, 0))],
            out_specs=pl.BlockSpec((block_rows, lane_w), lambda i: (i, 0)),
        ),
        compiler_params=pltpu.CompilerParams(
            dimension_semantics=("parallel",),
            vmem_limit_bytes=32 * 1024 * 1024,
        ),
    )(x2d)

    out = out2d.reshape(-1)
    if pad:
        out = out[:n]
    return out.reshape(orig_shape)


class Model:
    """JAX/Pallas equivalent of the PyTorch Model (single ReLU)."""

    def __call__(self, x: jax.Array) -> jax.Array:
        return relu_pallas(x)


if __name__ == "__main__":
    key = jax.random.PRNGKey(0)

    # Raw data consistent with the reference preprocessing, then the module's
    # torch.reshape(input, (-1, 1, 2, 2)) -> NCHW (512, 1, 2, 2).
    raw = jax.random.normal(key, (2, 4, 16, 16), dtype=jnp.float32)
    x = raw.reshape(-1, 1, 2, 2)

    model = Model()

    # Forward pass through the module wrapper (tiny input -> fused XLA path).
    out_model = jax.block_until_ready(model(x))

    # Force the Pallas kernel path once on the same data.
    out_pallas = jax.block_until_ready(relu_pallas(x, min_pallas_elems=0))

    # Also exercise the (rare) non-multiple-of-128 pad path.
    x_odd = jax.random.normal(jax.random.PRNGKey(1), (9, 1, 2, 2),
                              dtype=jnp.float32)
    out_odd = jax.block_until_ready(relu_pallas(x_odd, min_pallas_elems=0))

    ref = jnp.maximum(x, 0.0)
    assert out_model.shape == x.shape and out_model.dtype == x.dtype
    assert out_pallas.shape == x.shape and out_pallas.dtype == x.dtype
    assert bool(jnp.allclose(out_model, ref)), "model ReLU mismatch"
    assert bool(jnp.allclose(out_pallas, ref)), "Pallas ReLU mismatch"
    assert bool(jnp.allclose(out_odd, jnp.maximum(x_odd, 0.0))), \
        "Pallas ReLU (pad path) mismatch"

    print("KERNEL_OK")
</pallas_src>

<mosaic_0001>
module attributes {stable_mosaic.version = 11 : i64} {
  func.func @_relu_kernel(%arg0: i32, %arg1: memref<1x2048xf32, #tpu.memory_space<vmem>>, %arg2: memref<1x2048xf32, #tpu.memory_space<vmem>>) attributes {dimension_semantics = [#tpu.dimension_semantics<parallel>], iteration_bounds = array<i64: 1>, scalar_prefetch = 0 : i64, scratch_operands = 0 : i64, tpu.core_type = #tpu.core_type<tc>, window_params = [{transform_indices = @transform_0, window_bounds = array<i64: 1, 2048>}, {transform_indices = @transform_1, window_bounds = array<i64: 1, 2048>}]} {
    %c0 = arith.constant 0 : index
    %c0_0 = arith.constant 0 : index
    %0 = vector.load %arg1[%c0, %c0_0] : memref<1x2048xf32, #tpu.memory_space<vmem>>, vector<1x2048xf32>
    %cst = arith.constant 0.000000e+00 : f32
    %1 = vector.broadcast %cst : f32 to vector<1x2048xf32>
    %2 = arith.maximumf %0, %1 : vector<1x2048xf32>
    %c0_1 = arith.constant 0 : index
    %c0_2 = arith.constant 0 : index
    %3 = vector.load %arg2[%c0_1, %c0_2] : memref<1x2048xf32, #tpu.memory_space<vmem>>, vector<1x2048xf32>
    tpu.vector_store %arg2[%c0_1, %c0_2], %2 {strides = array<i32>} : memref<1x2048xf32, #tpu.memory_space<vmem>>, vector<1x2048xf32>,
    return
  }
  func.func @transform_0(%arg0: i32) -> (i32, i32) {
    %c0_i32 = arith.constant 0 : i32
    %c0_i32_0 = arith.constant 0 : i32
    return %arg0, %c0_i32 : i32, i32
  }
  func.func @transform_1(%arg0: i32) -> (i32, i32) {
    %c0_i32 = arith.constant 0 : i32
    %c0_i32_0 = arith.constant 0 : i32
    return %arg0, %c0_i32 : i32, i32
  }
}

</mosaic_0001>

<bundles_post_ra>
// kernel: tpu_custom_call.1
= control target key start
LH: loop header
LB: loop body
LE: loop exit
PB: predicated region body
PF: predicated region fallthrough
CT: control target
= control target key end

     0   :  { %6 = vsyncpa [#allocation3], 0  ;;  %s118_s0 = inlined_call_operand.hbm [shape: f32[1,2048], index: 0, kind: input, shape index: {}]   ;;  %s119_s1 = inlined_call_operand.hbm [shape: f32[1,2048], index: 1, kind: output, shape index: {}]  }
   0x1   :  { %7 = vsyncpa [#allocation4], 0  ;;  %s13_s8 = sshll.u32 %s118_s0, 4  ;;  %s100_s9 = smov [#allocation2]   ;;  %s14_s8 = int_to_ptr.hbm [resolvable:$true] %s13_s8 }
   0x2   :  { %s15_s10 = sshll.u32 %s100_s9, 4  ;;  %s16_s10 = int_to_ptr.vmem [resolvable:$true] %s15_s10 }
   0x3   :  { %18 = dma.hbm_to_vmem [thread:$0]  %s14_s8, 256, %s16_s10, [#allocation3]  }
   0x4   :  { %96 = dma.done.wait [#allocation3], 256  }
   0x5   :  { %97 = vsyncadd [#allocation3], 4294967040  ;;  %s101_s11 = smov [#allocation5]   ;;  %s36_s15 = sshll.u32 %s119_s1, 4  ;;  %v23_v0 = vld [vmem:[#allocation2] sm:$0xff]  ;;  %v24_v1 = vld [vmem:[#allocation2 + $0x8] sm:$0xff]  ;;  %s37_s15 = int_to_ptr.hbm [resolvable:$true] %s36_s15 }
   0x6   :  { %s34_s12 = sshll.u32 %s101_s11, 4  ;;  %v25_v2 = vmax.f32 %v23_v0, 0.0  ;;  %v26_v3 = vmax.f32 %v24_v1, 0.0  ;;  %s35_s12 = int_to_ptr.vmem [resolvable:$true] %s34_s12 }
   0x8   :  { %27 = vst [vmem:[#allocation5] sm:$0xff] %v25_v2 }
   0x9   :  { %28 = vst [vmem:[#allocation5 + $0x8] sm:$0xff] %v26_v3 }
   0xa   :  { %39 = dma.vmem_to_hbm [thread:$0]  %s35_s12, 256, %s37_s15, [#allocation4]  }
   0xb   :  { %98 = dma.done.wait [#allocation4], 256  }
   0xc   :  { %99 = vsyncadd [#allocation4], 4294967040 }
   0xd   :  { %44 = vsyncpa [#allocation3], 1 }
   0xe   :  { %45 = vsyncpa [#allocation4], 1 }

</bundles_post_ra>
